<compile_context>
chip_gen: v7x
topology: tpu7x:2x2x1
jax: 0.10.0
libtpu: 0.0.40
codegen_flags: <defaults>
</compile_context>

<pallas_src>
import jax
import jax.numpy as jnp
from jax import lax
from jax.experimental import pallas as pl
from jax.experimental.pallas import tpu as pltpu


# ----------------------------- Pallas kernel --------------------------------
def _pixelnerf_fwd_kernel(x_ref, w1_ref, b1_ref, w2_ref, b2_ref, out_ref):
    # x:   (SB*6, TB)  bf16  block-diagonal points (lane block s = object s)
    # w1:  (H, SB*6)   bf16  concatenated effective first-layer weight
    # b1:  (H, TB)     f32   per-object effective bias, broadcast on lanes
    # w2:  (4, H)      bf16  second-layer weight (pre-transposed, shared)
    # b2:  (4, 1)      f32   second-layer bias
    # out: (4, TB)     f32   rows 0-2 = rgb feat, row 3 = relu(sigma)
    h = jnp.dot(w1_ref[...], x_ref[...],
                preferred_element_type=jnp.float32)           # (H, TB) f32
    h = jnp.maximum(h + b1_ref[...], 0.0)                     # bias+ReLU in f32
    out = jnp.dot(w2_ref[...], h.astype(w2_ref.dtype),
                  preferred_element_type=jnp.float32) + b2_ref[...]   # (4, TB)
    # ReLU only on the sigma row (row 3) via a mask select (built once).
    row = lax.broadcasted_iota(jnp.int32, out.shape, 0)
    out_ref[...] = jnp.where(row == 3, jnp.maximum(out, 0.0), out)


# ------------------------------- wrapper -------------------------------------
def pixelnerf_forward(xyz, viewdirs, poses_rt, shape_lat, app_lat, params,
                      num_pts):
    """xyz, viewdirs: (SB, B, 3); poses_rt: (SB, 3, 4); latents: (SB, 1, L)."""
    SB, B, _ = xyz.shape
    assert B % num_pts == 0
    H = params["w1z"].shape[-1]
    N = SB * B
    N_pad = ((N + 127) // 128) * 128          # lane dim multiple of 128

    # ---- plain-JAX parameter folding (exact algebraic rewrites) ------------
    R = poses_rt[:, :, :3]                                    # (SB, 3, 3)
    # xyz_rot @ w1z == xyz @ (R^T @ w1z)
    w1z_eff = jnp.einsum("sji,jh->sih", R, params["w1z"])     # (SB, 3, H)
    w1v_eff = jnp.einsum("sji,jh->sih", R, params["w1v"])     # (SB, 3, H)
    w1_eff = jnp.concatenate([w1z_eff, w1v_eff], axis=1)      # (SB, 6, H)
    w1_cat = jnp.transpose(w1_eff, (2, 0, 1)).reshape(H, SB * 6)   # (H, SB*6)
    b1_eff = (shape_lat @ params["w1s"] + app_lat @ params["w1a"]
              + params["b1"][None])[:, 0, :]                  # (SB, H)
    b1_slab = jnp.repeat(b1_eff.T, B, axis=1)                 # (H, SB*B)
    w2_t = params["w2"].T                                     # (4, H)
    b2_t = params["b2"].T                                     # (4, 1)

    # ---- lane-merged, block-diagonal point slab -----------------------------
    x = jnp.concatenate([xyz, viewdirs], axis=-1)             # (SB, B, 6)
    x_t = jnp.swapaxes(x, 1, 2)                               # (SB, 6, B)
    eye = jnp.eye(SB, dtype=x.dtype)
    x_blk = (x_t[:, :, None, :] * eye[:, None, :, None]).reshape(SB * 6, N)

    if N_pad != N:
        x_blk = jnp.pad(x_blk, ((0, 0), (0, N_pad - N)))
        b1_slab = jnp.pad(b1_slab, ((0, 0), (0, N_pad - N)))

    # bf16 operands; accumulation stays f32 inside the kernel.
    x_blk = x_blk.astype(jnp.bfloat16)
    w1_cat = w1_cat.astype(jnp.bfloat16)
    w2_t = w2_t.astype(jnp.bfloat16)

    # ---- lane tiling: biggest 128-multiple tile that divides N_pad ----------
    TB = 128
    for cand in (2048, 1024, 512, 256, 128):
        if N_pad % cand == 0:
            TB = cand
            break
    grid = (N_pad // TB,)

    grid_spec = pltpu.PrefetchScalarGridSpec(
        num_scalar_prefetch=0,
        grid=grid,
        in_specs=[
            pl.BlockSpec((SB * 6, TB), lambda j: (0, j)),     # x_blk
            pl.BlockSpec((H, SB * 6), lambda j: (0, 0)),      # W1_cat
            pl.BlockSpec((H, TB), lambda j: (0, j)),          # b1_slab
            pl.BlockSpec((4, H), lambda j: (0, 0)),           # W2^T
            pl.BlockSpec((4, 1), lambda j: (0, 0)),           # b2
        ],
        out_specs=pl.BlockSpec((4, TB), lambda j: (0, j)),
    )

    out_slab = pl.pallas_call(
        _pixelnerf_fwd_kernel,
        out_shape=jax.ShapeDtypeStruct((4, N_pad), jnp.float32),
        grid_spec=grid_spec,
        compiler_params=pltpu.CompilerParams(
            dimension_semantics=("parallel",),        # shards lane tiles over TCs (v7x)
            vmem_limit_bytes=32 * 1024 * 1024),
    )(x_blk, w1_cat, b1_slab, w2_t, b2_t)

    # presentation layout: (SB, B, 4), matching output.reshape(SB, B, -1).
    # (A downstream consumer could take the lane-dense (4, SB*B) slab directly
    #  and skip this transpose.)
    out = out_slab[:, :N].reshape(4, SB, B)
    return jnp.transpose(out, (1, 2, 0))


# --------------------------- plain-JAX reference ------------------------------
def pixelnerf_forward_ref(xyz, viewdirs, poses_rt, shape_lat, app_lat, params,
                          num_pts):
    R = poses_rt[:, :, :3]                                    # (SB, 3, 3)
    xyz_rot = jnp.einsum("sij,sbj->sbi", R, xyz)
    vdr_rot = jnp.einsum("sij,sbj->sbi", R, viewdirs)
    h = (xyz_rot @ params["w1z"] + vdr_rot @ params["w1v"]
         + shape_lat @ params["w1s"] + app_lat @ params["w1a"]
         + params["b1"][None])
    h = jnp.maximum(h, 0.0)
    out = h @ params["w2"] + params["b2"][None]
    feat = out[..., :3]
    sigma = jnp.maximum(out[..., 3:4], 0.0)
    return jnp.concatenate([feat, sigma], axis=-1)


# --------------------------------- main --------------------------------------
if __name__ == "__main__":
    SB, B, num_pts = 2, 64, 8          # SB objects, B points per object
    Ls, La, H = 16, 16, 32             # shape/appearance latent sizes, MLP hidden

    key = jax.random.PRNGKey(0)
    ks = jax.random.split(key, 12)

    xyz = jax.random.normal(ks[0], (SB, B, 3), jnp.float32)
    viewdirs = jax.random.normal(ks[1], (SB, B, 3), jnp.float32)
    viewdirs = viewdirs / jnp.linalg.norm(viewdirs, axis=-1, keepdims=True)

    # encode()-style pose glue: build camera-to-world poses, invert to [R^T | -R^T t].
    ang = jnp.array([0.3, -0.7], jnp.float32)
    c, s = jnp.cos(ang), jnp.sin(ang)
    zeros, ones = jnp.zeros_like(ang), jnp.ones_like(ang)
    rot_c2w = jnp.stack(
        [jnp.stack([c, -s, zeros], -1),
         jnp.stack([s, c, zeros], -1),
         jnp.stack([zeros, zeros, ones], -1)], axis=1)        # (SB, 3, 3)
    trans_c2w = jax.random.normal(ks[2], (SB, 3, 1), jnp.float32)
    rot = jnp.swapaxes(rot_c2w, 1, 2)                         # R^T
    trans = -jnp.einsum("sij,sjk->sik", rot, trans_c2w)       # -R^T t
    poses_rt = jnp.concatenate([rot, trans], axis=-1)         # (SB, 3, 4)

    # per-object latents (stand-in for encoder's shape / appearance codes)
    shape_lat = jax.random.normal(ks[3], (SB, 1, Ls), jnp.float32)
    app_lat = jax.random.normal(ks[4], (SB, 1, La), jnp.float32)

    # deterministic decoder-MLP parameters
    params = {
        "w1z": 0.2 * jax.random.normal(ks[5], (3, H), jnp.float32),
        "w1v": 0.2 * jax.random.normal(ks[6], (3, H), jnp.float32),
        "w1s": 0.2 * jax.random.normal(ks[7], (Ls, H), jnp.float32),
        "w1a": 0.2 * jax.random.normal(ks[8], (La, H), jnp.float32),
        "b1": 0.1 * jax.random.normal(ks[9], (1, H), jnp.float32),
        "w2": 0.2 * jax.random.normal(ks[10], (H, 4), jnp.float32),
        "b2": 0.1 * jax.random.normal(ks[11], (1, 4), jnp.float32),
    }

    out = pixelnerf_forward(xyz, viewdirs, poses_rt, shape_lat, app_lat,
                            params, num_pts)
    out = jax.block_until_ready(out)

    ref = pixelnerf_forward_ref(xyz, viewdirs, poses_rt, shape_lat, app_lat,
                                params, num_pts)
    assert out.shape == (SB, B, 4)
    # tolerance covers bf16 operand rounding (accumulation is f32)
    assert jnp.allclose(out, ref, atol=1e-1, rtol=1e-1)

    print("KERNEL_OK")
</pallas_src>

<mosaic_0001>
module attributes {stable_mosaic.version = 11 : i64} {
  func.func @_pixelnerf_fwd_kernel(%arg0: i32, %arg1: memref<12x128xbf16, #tpu.memory_space<vmem>>, %arg2: memref<32x12xbf16, #tpu.memory_space<vmem>>, %arg3: memref<32x128xf32, #tpu.memory_space<vmem>>, %arg4: memref<4x32xbf16, #tpu.memory_space<vmem>>, %arg5: memref<4x1xf32, #tpu.memory_space<vmem>>, %arg6: memref<4x128xf32, #tpu.memory_space<vmem>>) attributes {dimension_semantics = [#tpu.dimension_semantics<parallel>], iteration_bounds = array<i64: 1>, scalar_prefetch = 0 : i64, scratch_operands = 0 : i64, tpu.core_type = #tpu.core_type<tc>, window_params = [{transform_indices = @transform_0, window_bounds = array<i64: 12, 128>}, {pipeline_mode = #tpu.pipeline_mode<synchronous>, transform_indices = @transform_1, window_bounds = array<i64: 32, 12>}, {transform_indices = @transform_2, window_bounds = array<i64: 32, 128>}, {pipeline_mode = #tpu.pipeline_mode<synchronous>, transform_indices = @transform_3, window_bounds = array<i64: 4, 32>}, {pipeline_mode = #tpu.pipeline_mode<synchronous>, transform_indices = @transform_4, window_bounds = array<i64: 4, 1>}, {transform_indices = @transform_5, window_bounds = array<i64: 4, 128>}]} {
    %c0 = arith.constant 0 : index
    %c0_0 = arith.constant 0 : index
    %0 = vector.load %arg2[%c0, %c0_0] : memref<32x12xbf16, #tpu.memory_space<vmem>>, vector<32x12xbf16>
    %c0_1 = arith.constant 0 : index
    %c0_2 = arith.constant 0 : index
    %1 = vector.load %arg1[%c0_1, %c0_2] : memref<12x128xbf16, #tpu.memory_space<vmem>>, vector<12x128xbf16>
    %cst = arith.constant dense<0.000000e+00> : vector<32x128xf32>
    %2 = tpu.matmul %0, %1, %cst {dimension_numbers = #tpu.dot_dimension_numbers<[1], [0], [0], [1], [0, 0, 1, 1], [], []>} : vector<32x12xbf16>, vector<12x128xbf16>, vector<32x128xf32> -> vector<32x128xf32>
    %c0_3 = arith.constant 0 : index
    %c0_4 = arith.constant 0 : index
    %3 = vector.load %arg3[%c0_3, %c0_4] : memref<32x128xf32, #tpu.memory_space<vmem>>, vector<32x128xf32>
    %4 = arith.addf %2, %3 : vector<32x128xf32>
    %cst_5 = arith.constant 0.000000e+00 : f32
    %5 = vector.broadcast %cst_5 : f32 to vector<32x128xf32>
    %6 = arith.maximumf %4, %5 : vector<32x128xf32>
    %c0_6 = arith.constant 0 : index
    %c0_7 = arith.constant 0 : index
    %7 = vector.load %arg4[%c0_6, %c0_7] : memref<4x32xbf16, #tpu.memory_space<vmem>>, vector<4x32xbf16>
    %8 = arith.truncf %6 : vector<32x128xf32> to vector<32x128xbf16>
    %cst_8 = arith.constant dense<0.000000e+00> : vector<4x128xf32>
    %9 = tpu.matmul %7, %8, %cst_8 {dimension_numbers = #tpu.dot_dimension_numbers<[1], [0], [0], [1], [0, 0, 1, 1], [], []>} : vector<4x32xbf16>, vector<32x128xbf16>, vector<4x128xf32> -> vector<4x128xf32>
    %c0_9 = arith.constant 0 : index
    %c0_10 = arith.constant 0 : index
    %10 = vector.load %arg5[%c0_9, %c0_10] : memref<4x1xf32, #tpu.memory_space<vmem>>, vector<4x1xf32>
    %11 = vector.broadcast %10 : vector<4x1xf32> to vector<4x128xf32>
    %12 = arith.addf %9, %11 : vector<4x128xf32>
    %13 = tpu.iota {dimensions = array<i32: 0>} : vector<4x128xi32>
    %c3_i32 = arith.constant 3 : i32
    %14 = vector.broadcast %c3_i32 : i32 to vector<4x128xi32>
    %15 = arith.cmpi eq, %13, %14 : vector<4x128xi32>
    %cst_11 = arith.constant 0.000000e+00 : f32
    %16 = vector.broadcast %cst_11 : f32 to vector<4x128xf32>
    %17 = arith.maximumf %12, %16 : vector<4x128xf32>
    %18 = arith.select %15, %17, %12 : vector<4x128xi1>, vector<4x128xf32>
    %c0_12 = arith.constant 0 : index
    %c0_13 = arith.constant 0 : index
    %19 = vector.load %arg6[%c0_12, %c0_13] : memref<4x128xf32, #tpu.memory_space<vmem>>, vector<4x128xf32>
    tpu.vector_store %arg6[%c0_12, %c0_13], %18 {strides = array<i32>} : memref<4x128xf32, #tpu.memory_space<vmem>>, vector<4x128xf32>,
    return
  }
  func.func @transform_0(%arg0: i32) -> (i32, i32) {
    %c0_i32 = arith.constant 0 : i32
    %c0_i32_0 = arith.constant 0 : i32
    return %c0_i32, %arg0 : i32, i32
  }
  func.func @transform_1(%arg0: i32) -> (i32, i32) {
    %c0_i32 = arith.constant 0 : i32
    %c0_i32_0 = arith.constant 0 : i32
    %c0_i32_1 = arith.constant 0 : i32
    return %c0_i32, %c0_i32_0 : i32, i32
  }
  func.func @transform_2(%arg0: i32) -> (i32, i32) {
    %c0_i32 = arith.constant 0 : i32
    %c0_i32_0 = arith.constant 0 : i32
    return %c0_i32, %arg0 : i32, i32
  }
  func.func @transform_3(%arg0: i32) -> (i32, i32) {
    %c0_i32 = arith.constant 0 : i32
    %c0_i32_0 = arith.constant 0 : i32
    %c0_i32_1 = arith.constant 0 : i32
    return %c0_i32, %c0_i32_0 : i32, i32
  }
  func.func @transform_4(%arg0: i32) -> (i32, i32) {
    %c0_i32 = arith.constant 0 : i32
    %c0_i32_0 = arith.constant 0 : i32
    %c0_i32_1 = arith.constant 0 : i32
    return %c0_i32, %c0_i32_0 : i32, i32
  }
  func.func @transform_5(%arg0: i32) -> (i32, i32) {
    %c0_i32 = arith.constant 0 : i32
    %c0_i32_0 = arith.constant 0 : i32
    return %c0_i32, %arg0 : i32, i32
  }
}

</mosaic_0001>

<bundles_post_ra>
// kernel: tpu_custom_call.1
= control target key start
LH: loop header
LB: loop body
LE: loop exit
PB: predicated region body
PF: predicated region fallthrough
CT: control target
= control target key end

     0   :  { %10 = vsyncpa [#allocation3], 0  ;;  %s370_s0 = inlined_call_operand.hbm [shape: bf16[12,128], index: 0, kind: input, shape index: {}]   ;;  %s371_s1 = inlined_call_operand.vmem [shape: bf16[32,12], index: 1, kind: input, shape index: {}]   ;;  %s372_s2 = inlined_call_operand.vmem [shape: f32[32,128], index: 2, kind: input, shape index: {}]   ;;  %s373_s3 = inlined_call_operand.vmem [shape: bf16[4,32], index: 3, kind: input, shape index: {}]   ;;  %s374_s4 = inlined_call_operand.vmem [shape: f32[4,1], index: 4, kind: input, shape index: {}]   ;;  %s375_s5 = inlined_call_operand.hbm [shape: f32[4,128], index: 5, kind: output, shape index: {}]  }
   0x1   :  { %11 = vsyncpa [#allocation4], 0  ;;  %s285_s18 = smov [#allocation2]   ;;  %s237_s22 = scalar_lea.hbm %s370_s0, 128 }
   0x2   :  { %s17_s19 = sshll.u32 %s285_s18, 4  ;;  %p238_p0 = scmp.ne.s32.totalorder %s370_s0, %s237_s22  ;;  %s18_s19 = int_to_ptr.vmem [resolvable:$true] %s17_s19 }
   0x3   :  { %p241_p1 = scmp.lt.u32.totalorder %s237_s22, %s370_s0 }
   0x5   :  { %p243_p2 = pnand %p241_p1, %p238_p0 }
   0x7   :  { %246 = shalt.err (!%p243_p2)
}
   0x8   :  { %s247_s27 = scalar_lea.vmem %s18_s19, 128  ;;  %p252_p4 = scmp.lt.s32.totalorder %s18_s19, %s18_s19 }
   0x9   :  { %p248_p3 = scmp.ne.s32.totalorder %s18_s19, %s247_s27  ;;  %p253_p5 = scmp.lt.s32.totalorder %s247_s27, %s247_s27 }
   0xb   :  { %p254_p6 = por %p253_p5, %p252_p4 }
   0xd   :  { %p255_p7 = pnand %p254_p6, %p248_p3 }
   0xf   :  { %258 = shalt.err (!%p255_p7)
}
  0x10   :  { %s286_s28 = smov 64   ;;  %s287_s29 = smov 4  }
  0x11   :  { %23 = dma.hbm_to_vmem [thread:$0]  %s370_s0, 128, %s18_s19, [#allocation3], %s286_s28, %s286_s28, %s287_s29  }
  0x12   :  { %281 = dma.done.wait [#allocation3], 128  }
  0x13   :  { %282 = vsyncadd [#allocation3], 4294967168  ;;  %vm68_vm0 = vcmask 1045504   ;;  %vm61_vm1 = vcmask 97280   ;;  %v234_v0 = vld [vmem:[#allocation2] sm:$0x3f]   ;;  %v178_v26 = vlaneseq }
  0x14   :  { %v235_v1 = vld [vmem:[%s371_s1] sm:$0xff]   ;;  %225 = vmatprep.subr.msk.bf16.mxu0 %vm68_vm0, %v234_v0  ;;  %v70_v2 = vsel %vm68_vm0, %v234_v0, 0  ;;  %v236_v3 = vld [vmem:[%s371_s1 + $0x8] sm:$0xff]   ;;  %v288_v4 = vmov 0.0   ;;  %vm289_vm2 = vmmov 0   ;;  %v290_v6 = vmov 0  }
  0x15   :  { %212 = vmatpush3.bf16.msra.mxu0 %v70_v2  ;;  %213 = vmatprep.mubr.msk.bf16.mxu0 %vm61_vm1, %v235_v1  ;;  %v128_v5 = vld [vmem:[%s374_s4] sm:$0xf]  ;;  %v44_v7 = vld [vmem:[%s372_s2 + $0x10] sm:$0xff]  ;;  %v45_v10 = vld [vmem:[%s372_s2 + $0x18] sm:$0xff]  ;;  %vm134_vm3 = vcmask 261120   ;;  %v179_v28 = vshrl.u32 %v178_v26, 7 }
  0x16   :  { %217 = vmatprep.subr.bf16.mxu1 %v288_v4  ;;  %221 = vmatprep.mubr.msk.bf16.mxu1 %vm289_vm2, %v288_v4  ;;  %v42_v8 = vld [vmem:[%s372_s2] sm:$0xff]  ;;  %v43_v13 = vld [vmem:[%s372_s2 + $0x8] sm:$0xff]  ;;  %s291_s2 = smov [#allocation5]  }
  0x17   :  { %233 = vset.pattern.permute.xlu0 %v290_v6  ;;  %v125_v25 = vld [vmem:[%s373_s3] sm:$0x3]  ;;  %s190_s20 = sshll.u32 %s291_s2, 4  ;;  %vm180_vm4 = vcmp.eq.s32.totalorder %v179_v28, 3  ;;  %s191_s20 = int_to_ptr.vmem [resolvable:$true] %s190_s20 }
  0x18   :  { %214 = vmatmul.mubr.msk.bf16.vlgmr.msra.gmra.mrb[0].mxu0 %vm61_vm1, %v236_v3  ;;  %131 = vperm.xlu0 %233, %v128_v5   ;;  %s259_s21 = scalar_lea.vmem %s191_s20, 64  ;;  %p264_p9 = scmp.lt.s32.totalorder %s191_s20, %s191_s20 }
  0x19   :  { %p260_p8 = scmp.ne.s32.totalorder %s191_s20, %s259_s21  ;;  %p265_p10 = scmp.lt.s32.totalorder %s259_s21, %s259_s21 }
  0x1b   :  { %p266_p11 = por %p265_p10, %p264_p9 }
  0x1d   :  { %p267_p12 = pnand %p266_p11, %p260_p8 }
  0x97   :  { %v132_v27 = vpop.permute.xlu0 %131 }
  0xeb   :  { %v215_v9 = vpop.f32.mrb[0].mxu0 }
  0xec   :  { %v115_v11 = vadd.f32 %v215_v9, %v44_v7  ;;  %v106_v12 = vpop.f32.mrb[1].mxu0 }
  0xed   :  { %v107_v14 = vadd.f32 %v106_v12, %v42_v8  ;;  %v216_v15 = vpop.f32.mrb[2].mxu0 }
  0xee   :  { %v118_v16 = vadd.f32 %v216_v15, %v45_v10  ;;  %v109_v17 = vpop.f32.mrb[3].mxu0  ;;  %v123_v19 = vmax.f32 %v115_v11, 0.0 }
  0xef   :  { %v110_v18 = vadd.f32 %v109_v17, %v43_v13  ;;  %v121_v21 = vmax.f32 %v107_v14, 0.0 }
  0xf0   :  { %v124_v20 = vmax.f32 %v118_v16, 0.0 }
  0xf1   :  { %v122_v22 = vmax.f32 %v110_v18, 0.0 }
  0xf2   :  { %v127_v23 = vpack.c.bf16 %v124_v20, %v123_v19 }
  0xf3   :  { %v126_v24 = vpack.c.bf16 %v122_v22, %v121_v21 }
  0xf5   :  { %218 = vmatpush3.bf16.msra.mxu1 %v126_v24 }
  0xf6   :  { %219 = vmatprep.subr.bf16.mxu1 %v288_v4 }
  0xf9   :  { %220 = vmatpush3.bf16.msra.mxu1 %v127_v23 }
  0xfc   :  { %222 = vmatmul.mubr.msk.bf16.vlgmr.msra.gmra.mrb[0].mxu1 %vm134_vm3, %v125_v25 }
 0x1cf   :  { %v172_v29 = vpop.f32.mrb[0].mxu1 }
 0x1d0   :  { %v173_v30 = vadd.f32 %v172_v29, %v132_v27  ;;  %v223_v31 = vpop.f32.mrb[1].mxu1 }
 0x1d1   :  { %v175_v32 = vpop.f32.mrb[2].mxu1 }
 0x1d2   :  { %v181_v33 = vmax.f32 %v173_v30, 0.0  ;;  %v224_v34 = vpop.f32.mrb[3].mxu1 }
 0x1d4   :  { %v182_v35 = vsel %vm180_vm4, %v181_v33, %v173_v30 }
 0x1d5   :  { %183 = vst [vmem:[#allocation5] sm:$0xf] %v182_v35 }
 0x1d6   :  { %270 = shalt.err (!%p267_p12)
}
 0x1d7   :  { %s271_s23 = scalar_lea.hbm %s375_s5, 64 }
 0x1d8   :  { %p272_p13 = scmp.ne.s32.totalorder %s375_s5, %s271_s23  ;;  %p275_p0 = scmp.lt.u32.totalorder %s271_s23, %s375_s5 }
 0x1da   :  { %p277_p1 = pnand %p275_p0, %p272_p13 }
 0x1dc   :  { %280 = shalt.err (!%p277_p1)
}
 0x1dd   :  { %193 = dma.vmem_to_hbm [thread:$0]  %s191_s20, 64, %s375_s5, [#allocation4]  }
 0x1de   :  { %283 = dma.done.wait [#allocation4], 64  }
 0x1df   :  { %284 = vsyncadd [#allocation4], 4294967232 }
 0x1e0   :  { %197 = vsyncpa [#allocation3], 1 }
 0x1e1   :  { %198 = vsyncpa [#allocation4], 1 }

</bundles_post_ra>
